<compile_context>
chip_gen: v7x
topology: tpu7x:2x2x1
jax: 0.10.0
libtpu: 0.0.40
codegen_flags: <defaults>
</compile_context>

<pallas_src>
import functools

import jax
import jax.numpy as jnp
from jax.experimental import pallas as pl
from jax.experimental.pallas import tpu as pltpu

_LANE = 128


def _focal_loss_kernel(logits_ref, labels_ref, out_ref, acc_ref, iota_ref, *,
                       gamma, n_valid, n_inner, tile):
    inner = pl.program_id(1)

    @pl.when(inner == 0)
    def _():
        acc_ref[...] = jnp.zeros_like(acc_ref)
        # class-index iota, hoisted: constant across all inner steps
        iota_ref[...] = jax.lax.broadcasted_iota(jnp.int32, iota_ref.shape, 0)

    x = logits_ref[...].astype(jnp.float32)              # (C, TN), rows on lanes
    labels = labels_ref[...]                              # (1, TN) int32

    # Softmax denominator over the (tiny) class axis: sublane reductions only.
    m = jnp.max(x, axis=0, keepdims=True)                 # (1, TN)
    e = jnp.exp(x - m)                                     # (C, TN)
    s = jnp.sum(e, axis=0, keepdims=True)                  # (1, TN)
    lse = m + jnp.log(s)                                   # folded normalizer

    # Gather the picked-class logit: exactly one row matches a valid label.
    row = iota_ref[...]                                    # (C, TN) int32
    x_t = jnp.sum(jnp.where(row == labels, x, 0.0),
                  axis=0, keepdims=True)                   # (1, TN)

    logp_t = x_t - lse                                     # log p[label]  (can be -inf, as in the reference)
    p_t = jnp.exp(logp_t)                                  # p[label]
    omp = 1.0 - p_t
    if isinstance(gamma, int) and gamma >= 1:
        focal = omp
        for _ in range(gamma - 1):                         # gamma=2 -> one VPU multiply
            focal = focal * omp
    elif isinstance(gamma, int) and gamma == 0:
        focal = jnp.ones_like(omp)
    else:
        focal = omp ** gamma                               # non-integer gamma: pow fallback on (1,TN) only
    contrib = focal * logp_t                               # (1, TN)

    # Mask the ragged tail (and any clamped fully-empty block) by global column.
    # Out-of-bounds logits/labels in a partial block are undefined, so this mask
    # is what keeps the sum correct without any host-side padding.
    base = (pl.program_id(0) * n_inner + inner) * tile
    col = base + jax.lax.broadcasted_iota(jnp.int32, contrib.shape, 1)
    acc_ref[...] += jnp.where(col < n_valid, contrib, 0.0)

    @pl.when(inner == pl.num_programs(1) - 1)
    def _():
        total = jnp.sum(acc_ref[...])                      # one reduce per outer block
        out_ref[...] = jnp.full(out_ref.shape, total, dtype=out_ref.dtype)


def _round_up(x, m):
    return ((x + m - 1) // m) * m


def _plan(n_rows, n_classes, itemsize, max_tile_rows=None):
    """Pick the lane (column) tile and the (outer, inner) grid factorization."""
    pack = max(1, 4 // itemsize)                           # sublane packing of the input dtype
    c_in = _round_up(max(n_classes, 1), 8 * pack)          # padded sublanes of the input block
    c_f32 = _round_up(max(n_classes, 1), 8)
    # VMEM bytes per lane column (conservative):
    per_col = (
        2 * c_in * itemsize       # double-buffered logits block (native dtype)
        + 2 * 8 * 4               # double-buffered labels block (pads to 8 sublanes)
        + 8 * 4                   # (1, tile) f32 accumulator scratch
        + c_f32 * 4               # (C, tile) int32 iota scratch
        + 3 * c_f32 * 4           # ~3 live (C, tile) f32 temporaries (x, e, select)
        + 8 * 8 * 4               # ~8 live (1, tile) temporaries
    )
    budget = 16 * 1024 * 1024
    cap = 32768 if max_tile_rows is None else max_tile_rows
    tile_cap = max(_LANE, (min(budget // per_col, cap) // _LANE) * _LANE)

    # Guarantee the 2-way outer split (v7x megacore) before sizing the tile.
    n_outer = 2 if n_rows >= 2 * _LANE else 1
    per_core = -(-n_rows // n_outer)
    n_inner = max(1, -(-per_core // tile_cap))
    tile = _round_up(-(-per_core // n_inner), _LANE)
    tile = min(tile, tile_cap)
    return tile, n_outer, n_inner


def my_focal_loss(y_preds, y_true, gamma=2, *, max_tile_rows=None):
    """Pallas implementation of MyFocalLoss.forward (weight=None path)."""
    y_pred = y_preds[1]
    C = y_pred.shape[-1]
    logits = y_pred.reshape(-1, C)                         # keep native dtype (bf16 stays bf16)
    labels = y_true.reshape(-1).astype(jnp.int32)
    N = logits.shape[0]

    # Integer-valued float gamma -> int so the kernel takes the unrolled path.
    if isinstance(gamma, float) and gamma.is_integer():
        gamma = int(gamma)

    tile, n_outer, n_inner = _plan(
        N, C, jnp.dtype(logits.dtype).itemsize, max_tile_rows)

    # Single relayout: flattened rows -> the 128-wide lane axis.  No padding.
    logits_t = logits.T                                    # (C, N)
    labels_t = labels.reshape(1, N)

    # Clamp block indices so no DMA starts past the array end; any fully-empty
    # block re-reads the last valid block and is zeroed by the in-kernel mask.
    last_blk = max(0, (N - 1) // tile)

    def _blk(o, i):
        return jnp.minimum(o * n_inner + i, last_blk)

    kernel = functools.partial(_focal_loss_kernel, gamma=gamma, n_valid=N,
                               n_inner=n_inner, tile=tile)

    partials = pl.pallas_call(
        kernel,
        out_shape=jax.ShapeDtypeStruct((n_outer, 8, _LANE), jnp.float32),
        grid=(n_outer, n_inner),
        in_specs=[
            pl.BlockSpec((C, tile), lambda o, i: (0, _blk(o, i))),
            pl.BlockSpec((1, tile), lambda o, i: (0, _blk(o, i))),
        ],
        out_specs=pl.BlockSpec((1, 8, _LANE), lambda o, i: (o, 0, 0)),
        scratch_shapes=[
            pltpu.VMEM((1, tile), jnp.float32),            # per-column accumulator
            pltpu.VMEM((C, tile), jnp.int32),              # hoisted class-index iota
        ],
        compiler_params=pltpu.CompilerParams(
            dimension_semantics=("parallel", "arbitrary"),
            vmem_limit_bytes=48 * 1024 * 1024,             # fits v7x's 64 MiB VMEM
        ),
    )(logits_t, labels_t)

    # One partial sum per outer block; finish (sum, /N, abs) in the wrapper.
    return jnp.abs(jnp.sum(partials[:, 0, 0]) / jnp.float32(N))


def _reference(y_preds, y_true, gamma=2):
    y_pred = y_preds[1]
    C = y_pred.shape[-1]
    x = y_pred.reshape(-1, C).astype(jnp.float32)
    t = y_true.reshape(-1).astype(jnp.int32)
    p = jax.nn.softmax(x, axis=-1)
    fl = (1.0 - p) ** gamma * jnp.log(p)
    picked = fl[jnp.arange(x.shape[0]), t]
    return jnp.abs(jnp.sum(picked) / x.shape[0])


if __name__ == "__main__":
    key = jax.random.PRNGKey(0)
    k1, k2, k3, k4, k5 = jax.random.split(key, 5)

    # Case 1: small f32 case implied by the module (batch=2, seq=8, classes=4).
    B, S, C = 2, 8, 4
    logits = jax.random.normal(k1, (B, S, C), dtype=jnp.float32)
    aux = jax.random.normal(k2, (B, S, C), dtype=jnp.float32)   # y_preds[0], unused
    y_preds = (aux, logits)
    y_true = jax.random.randint(k3, (B, S), 0, C, dtype=jnp.int32)

    loss = jax.block_until_ready(my_focal_loss(y_preds, y_true, gamma=2))
    ref = _reference(y_preds, y_true, gamma=2)
    assert jnp.allclose(loss, ref, rtol=1e-5, atol=1e-5), (loss, ref)

    # Case 2: bf16 logits, ragged row count, default (large-tile) plan — exercises
    # the native-dtype DMA, the in-kernel tail mask and the 2-way outer split.
    N2, C2 = 600, 5
    logits2 = jax.random.normal(k4, (N2, C2)).astype(jnp.bfloat16)
    y_preds2 = (logits2, logits2)
    y_true2 = jax.random.randint(k5, (N2,), 0, C2, dtype=jnp.int32)

    loss2 = jax.block_until_ready(my_focal_loss(y_preds2, y_true2, gamma=2.0))
    ref2 = _reference(y_preds2, y_true2, gamma=2)
    assert jnp.allclose(loss2, ref2, rtol=1e-4, atol=1e-4), (loss2, ref2)

    # Case 3: same data, tiny tile cap — exercises the multi-step inner axis and
    # the clamped (fully out-of-range) trailing block.
    loss3 = jax.block_until_ready(
        my_focal_loss(y_preds2, y_true2, gamma=2, max_tile_rows=128))
    assert jnp.allclose(loss3, ref2, rtol=1e-4, atol=1e-4), (loss3, ref2)

    print("KERNEL_OK")
</pallas_src>

<mosaic_0001>
module attributes {stable_mosaic.version = 11 : i64} {
  func.func @_focal_loss_kernel(%arg0: i32, %arg1: i32, %arg2: memref<4x128xf32, #tpu.memory_space<vmem>>, %arg3: memref<1x128xi32, #tpu.memory_space<vmem>>, %arg4: memref<1x8x128xf32, #tpu.memory_space<vmem>>, %arg5: memref<1x128xf32, #tpu.memory_space<vmem>>, %arg6: memref<4x128xi32, #tpu.memory_space<vmem>>) attributes {dimension_semantics = [#tpu.dimension_semantics<parallel>, #tpu.dimension_semantics<arbitrary>], iteration_bounds = array<i64: 1, 1>, scalar_prefetch = 0 : i64, scratch_operands = 2 : i64, tpu.core_type = #tpu.core_type<tc>, window_params = [{transform_indices = @transform_0, window_bounds = array<i64: 4, 128>}, {transform_indices = @transform_1, window_bounds = array<i64: 1, 128>}, {transform_indices = @transform_2, window_bounds = array<i64: 1, 8, 128>}]} {
    %c0_i32 = arith.constant 0 : i32
    %0 = arith.cmpi eq, %arg1, %c0_i32 : i32
    %1 = arith.extui %0 : i1 to i32
    %c0_i32_0 = arith.constant 0 : i32
    %2 = arith.cmpi ne, %1, %c0_i32_0 : i32
    scf.if %2 {
      %cst_17 = arith.constant 0.000000e+00 : f32
      %43 = vector.broadcast %cst_17 : f32 to vector<1x128xf32>
      %c0_18 = arith.constant 0 : index
      %c0_19 = arith.constant 0 : index
      %44 = vector.load %arg5[%c0_18, %c0_19] : memref<1x128xf32, #tpu.memory_space<vmem>>, vector<1x128xf32>
      tpu.vector_store %arg5[%c0_18, %c0_19], %43 {strides = array<i32>} : memref<1x128xf32, #tpu.memory_space<vmem>>, vector<1x128xf32>,
      %45 = tpu.iota {dimensions = array<i32: 0>} : vector<4x128xi32>
      %c0_20 = arith.constant 0 : index
      %c0_21 = arith.constant 0 : index
      %46 = vector.load %arg6[%c0_20, %c0_21] : memref<4x128xi32, #tpu.memory_space<vmem>>, vector<4x128xi32>
      tpu.vector_store %arg6[%c0_20, %c0_21], %45 {strides = array<i32>} : memref<4x128xi32, #tpu.memory_space<vmem>>, vector<4x128xi32>,
    } else {
    }
    %c0 = arith.constant 0 : index
    %c0_1 = arith.constant 0 : index
    %3 = vector.load %arg2[%c0, %c0_1] : memref<4x128xf32, #tpu.memory_space<vmem>>, vector<4x128xf32>
    %c0_2 = arith.constant 0 : index
    %c0_3 = arith.constant 0 : index
    %4 = vector.load %arg3[%c0_2, %c0_3] : memref<1x128xi32, #tpu.memory_space<vmem>>, vector<1x128xi32>
    %cst = arith.constant dense<0xFF800000> : vector<128xf32>
    %5 = vector.multi_reduction <maximumf>, %3, %cst [0] : vector<4x128xf32> to vector<128xf32>
    %6 = vector.shape_cast %5 : vector<128xf32> to vector<1x128xf32>
    %7 = vector.broadcast %6 : vector<1x128xf32> to vector<4x128xf32>
    %8 = arith.subf %3, %7 : vector<4x128xf32>
    %9 = math.exp %8 : vector<4x128xf32>
    %cst_4 = arith.constant dense<0.000000e+00> : vector<128xf32>
    %10 = vector.multi_reduction <add>, %9, %cst_4 [0] : vector<4x128xf32> to vector<128xf32>
    %11 = vector.shape_cast %10 : vector<128xf32> to vector<1x128xf32>
    %12 = math.log %11 : vector<1x128xf32>
    %13 = arith.addf %6, %12 : vector<1x128xf32>
    %c0_5 = arith.constant 0 : index
    %c0_6 = arith.constant 0 : index
    %14 = vector.load %arg6[%c0_5, %c0_6] : memref<4x128xi32, #tpu.memory_space<vmem>>, vector<4x128xi32>
    %15 = vector.broadcast %4 : vector<1x128xi32> to vector<4x128xi32>
    %16 = arith.cmpi eq, %14, %15 : vector<4x128xi32>
    %cst_7 = arith.constant 0.000000e+00 : f32
    %17 = vector.broadcast %cst_7 : f32 to vector<4x128xf32>
    %18 = arith.select %16, %3, %17 : vector<4x128xi1>, vector<4x128xf32>
    %cst_8 = arith.constant dense<0.000000e+00> : vector<128xf32>
    %19 = vector.multi_reduction <add>, %18, %cst_8 [0] : vector<4x128xf32> to vector<128xf32>
    %20 = vector.shape_cast %19 : vector<128xf32> to vector<1x128xf32>
    %21 = arith.subf %20, %13 : vector<1x128xf32>
    %22 = math.exp %21 : vector<1x128xf32>
    %cst_9 = arith.constant 1.000000e+00 : f32
    %23 = vector.broadcast %cst_9 : f32 to vector<1x128xf32>
    %24 = arith.subf %23, %22 : vector<1x128xf32>
    %25 = arith.mulf %24, %24 : vector<1x128xf32>
    %26 = arith.mulf %25, %21 : vector<1x128xf32>
    %c1_i32 = arith.constant 1 : i32
    %27 = arith.muli %arg0, %c1_i32 : i32
    %28 = arith.addi %27, %arg1 : i32
    %c128_i32 = arith.constant 128 : i32
    %29 = arith.muli %28, %c128_i32 : i32
    %30 = tpu.iota {dimensions = array<i32: 1>} : vector<1x128xi32>
    %31 = vector.broadcast %29 : i32 to vector<1x128xi32>
    %32 = arith.addi %31, %30 : vector<1x128xi32>
    %c0_10 = arith.constant 0 : index
    %c0_11 = arith.constant 0 : index
    %33 = vector.load %arg5[%c0_10, %c0_11] : memref<1x128xf32, #tpu.memory_space<vmem>>, vector<1x128xf32>
    %c16_i32 = arith.constant 16 : i32
    %34 = vector.broadcast %c16_i32 : i32 to vector<1x128xi32>
    %35 = arith.cmpi slt, %32, %34 : vector<1x128xi32>
    %cst_12 = arith.constant 0.000000e+00 : f32
    %36 = vector.broadcast %cst_12 : f32 to vector<1x128xf32>
    %37 = arith.select %35, %26, %36 : vector<1x128xi1>, vector<1x128xf32>
    %38 = arith.addf %33, %37 : vector<1x128xf32>
    %c0_13 = arith.constant 0 : index
    %c0_14 = arith.constant 0 : index
    %39 = vector.load %arg5[%c0_13, %c0_14] : memref<1x128xf32, #tpu.memory_space<vmem>>, vector<1x128xf32>
    tpu.vector_store %arg5[%c0_13, %c0_14], %38 {strides = array<i32>} : memref<1x128xf32, #tpu.memory_space<vmem>>, vector<1x128xf32>,
    %c0_i32_15 = arith.constant 0 : i32
    %40 = arith.cmpi eq, %arg1, %c0_i32_15 : i32
    %41 = arith.extui %40 : i1 to i32
    %c0_i32_16 = arith.constant 0 : i32
    %42 = arith.cmpi ne, %41, %c0_i32_16 : i32
    scf.if %42 {
      %c0_17 = arith.constant 0 : index
      %c0_18 = arith.constant 0 : index
      %43 = vector.load %arg5[%c0_17, %c0_18] : memref<1x128xf32, #tpu.memory_space<vmem>>, vector<1x128xf32>
      %44 = vector.shape_cast %43 : vector<1x128xf32> to vector<1x1x128xf32>
      %cst_19 = arith.constant dense<0.000000e+00> : vector<1xf32>
      %45 = vector.multi_reduction <add>, %44, %cst_19 [1, 2] : vector<1x1x128xf32> to vector<1xf32>
      %46 = vector.shape_cast %45 : vector<1xf32> to vector<1x1x1xf32>
      %47 = vector.extract %46[0, 0, 0] : f32 from vector<1x1x1xf32>
      %48 = vector.broadcast %47 : f32 to vector<1x8x128xf32>
      %c0_20 = arith.constant 0 : index
      %c0_21 = arith.constant 0 : index
      %c0_22 = arith.constant 0 : index
      %49 = vector.load %arg4[%c0_20, %c0_21, %c0_22] : memref<1x8x128xf32, #tpu.memory_space<vmem>>, vector<1x8x128xf32>
      tpu.vector_store %arg4[%c0_20, %c0_21, %c0_22], %48 {strides = array<i32>} : memref<1x8x128xf32, #tpu.memory_space<vmem>>, vector<1x8x128xf32>,
    } else {
    }
    return
  }
  func.func @transform_0(%arg0: i32, %arg1: i32) -> (i32, i32) {
    %c1_i32 = arith.constant 1 : i32
    %0 = arith.muli %arg0, %c1_i32 : i32
    %1 = arith.addi %0, %arg1 : i32
    %c0_i32 = arith.constant 0 : i32
    %2 = arith.minsi %1, %c0_i32 : i32
    %c0_i32_0 = arith.constant 0 : i32
    %c0_i32_1 = arith.constant 0 : i32
    return %c0_i32_0, %2 : i32, i32
  }
  func.func @transform_1(%arg0: i32, %arg1: i32) -> (i32, i32) {
    %c1_i32 = arith.constant 1 : i32
    %0 = arith.muli %arg0, %c1_i32 : i32
    %1 = arith.addi %0, %arg1 : i32
    %c0_i32 = arith.constant 0 : i32
    %2 = arith.minsi %1, %c0_i32 : i32
    %c0_i32_0 = arith.constant 0 : i32
    %c0_i32_1 = arith.constant 0 : i32
    return %c0_i32_0, %2 : i32, i32
  }
  func.func @transform_2(%arg0: i32, %arg1: i32) -> (i32, i32, i32) {
    %c0_i32 = arith.constant 0 : i32
    %c0_i32_0 = arith.constant 0 : i32
    %c0_i32_1 = arith.constant 0 : i32
    return %arg0, %c0_i32, %c0_i32_0 : i32, i32, i32
  }
}

</mosaic_0001>

<bundles_post_ra>
// kernel: tpu_custom_call.1
= control target key start
LH: loop header
LB: loop body
LE: loop exit
PB: predicated region body
PF: predicated region fallthrough
CT: control target
= control target key end

     0   :  { %7 = vsyncpa [#allocation5], 0  ;;  %s263_s0 = inlined_call_operand.hbm [shape: f32[4,16], index: 0, kind: input, shape index: {}]   ;;  %s264_s1 = inlined_call_operand.vmem [shape: s32[1,16], index: 1, kind: input, shape index: {}]   ;;  %s265_s2 = inlined_call_operand.hbm [shape: f32[1,8,128], index: 2, kind: output, shape index: {}]  }
   0x1   :  { %8 = vsyncpa [#allocation6], 0  ;;  %s215_s9 = smov [#allocation4]   ;;  %s167_s13 = scalar_lea.hbm %s263_s0, 64 }
   0x2   :  { %s20_s10 = sshll.u32 %s215_s9, 4  ;;  %p168_p0 = scmp.ne.s32.totalorder %s263_s0, %s167_s13  ;;  %s21_s10 = int_to_ptr.vmem [resolvable:$true] %s20_s10 }
   0x3   :  { %p171_p1 = scmp.lt.u32.totalorder %s167_s13, %s263_s0 }
   0x5   :  { %p173_p2 = pnand %p171_p1, %p168_p0 }
   0x7   :  { %176 = shalt.err (!%p173_p2)
}
   0x8   :  { %s177_s18 = scalar_lea.vmem %s21_s10, 64  ;;  %p182_p4 = scmp.lt.s32.totalorder %s21_s10, %s21_s10 }
   0x9   :  { %p178_p3 = scmp.ne.s32.totalorder %s21_s10, %s177_s18  ;;  %p183_p5 = scmp.lt.s32.totalorder %s177_s18, %s177_s18 }
   0xb   :  { %p184_p6 = por %p183_p5, %p182_p4 }
   0xd   :  { %p185_p7 = pnand %p184_p6, %p178_p3 }
   0xf   :  { %188 = shalt.err (!%p185_p7)
}
  0x10   :  { %23 = dma.hbm_to_vmem [thread:$0]  %s263_s0, 64, %s21_s10, [#allocation5]  }
  0x11   :  { %211 = dma.done.wait [#allocation5], 64  }
  0x12   :  { %212 = vsyncadd [#allocation5], 4294967232  ;;  %v61_v0 = vlaneseq  ;;  %v216_v1 = vmov 0.0   ;;  %vm66_vm0 = vcmask 1043456   ;;  %v64_v3 = vld [vmem:[#allocation4] sm:$0xf] }
  0x13   :  { %60 = vst [vmem:[#allocation2] sm:$0x1] %v216_v1  ;;  %v67_v4 = vsel %vm66_vm0, %v64_v3, -inf  ;;  %v155_v13 = vld [vmem:[%s264_s1] ss:$0 sm:$0xff]  ;;  %vm122_vm3 = vcmask 1040384  }
  0x14   :  { %v62_v2 = vshrl.u32 %v61_v0, 7  ;;  %v68_v5 = vrot.slane %v67_v4, 4  ;;  %v110_v37 = vand.u32 127, %v61_v0  ;;  %s217_s1 = smov [#allocation7]  }
  0x15   :  { %s141_s22 = sshll.u32 %s217_s1, 4  ;;  %s142_s22 = int_to_ptr.vmem [resolvable:$true] %s141_s22 }
  0x16   :  { %63 = vst [vmem:[#allocation3] sm:$0xf] %v62_v2  ;;  %v69_v6 = vmax.f32 %v67_v4, %v68_v5  ;;  %vm114_vm2 = vcmp.lt.s32.totalorder %v110_v37, 16  ;;  %s189_s24 = scalar_lea.vmem %s142_s22, 128  ;;  %p194_p9 = scmp.lt.s32.totalorder %s142_s22, %s142_s22 }
  0x17   :  { %p190_p8 = scmp.ne.s32.totalorder %s142_s22, %s189_s24  ;;  %p195_p10 = scmp.lt.s32.totalorder %s189_s24, %s189_s24 }
  0x18   :  { %v70_v7 = vrot.slane %v69_v6, 2 }
  0x19   :  { %p196_p11 = por %p195_p10, %p194_p9 }
  0x1a   :  { %v71_v8 = vmax.f32 %v69_v6, %v70_v7  ;;  %v113_v41 = vld [vmem:[#allocation2] sm:$0x1] }
  0x1b   :  { %p197_p12 = pnand %p196_p11, %p190_p8 }
  0x1c   :  { %v72_v9 = vrot.slane %v71_v8, 1 }
  0x1d   :  { %v87_v14 = vld [vmem:[#allocation3] sm:$0xf] }
  0x1e   :  { %v73_v10 = vmax.f32 %v71_v8, %v72_v9  ;;  %vm92_vm1 = vcmp.eq.s32.totalorder %v87_v14, %v155_v13 }
  0x1f   :  { %v93_v15 = vsel %vm92_vm1, %v64_v3, 0.0 }
  0x20   :  { %v74_v11 = vsub.f32 %v64_v3, %v73_v10  ;;  %v94_v19 = vsel %vm66_vm0, %v93_v15, 0.0 }
  0x21   :  { %v95_v21 = vrot.slane %v94_v19, 4 }
  0x22   :  { %v75_v12 = vmul.f32 1.442695, %v74_v11 }
  0x23   :  { %v96_v24 = vadd.f32 %v95_v21, %v94_v19 }
  0x24   :  { %161 = vpow2.f32 %v75_v12 }
  0x25   :  { %v97_v27 = vrot.slane %v96_v24, 2 }
  0x27   :  { %v98_v28 = vadd.f32 %v97_v27, %v96_v24 }
  0x29   :  { %v99_v29 = vrot.slane %v98_v28, 1 }
  0x2b   :  { %v100_v32 = vadd.f32 %v99_v29, %v98_v28 }
  0x2e   :  { %v162_v16 = vpop.eup %161 }
  0x2f   :  { %v77_v17 = vsel %vm66_vm0, %v162_v16, 0.0 }
  0x30   :  { %v78_v18 = vrot.slane %v77_v17, 4 }
  0x32   :  { %v79_v20 = vadd.f32 %v78_v18, %v77_v17 }
  0x34   :  { %v80_v22 = vrot.slane %v79_v20, 2 }
  0x36   :  { %v81_v23 = vadd.f32 %v80_v22, %v79_v20 }
  0x38   :  { %v82_v25 = vrot.slane %v81_v23, 1 }
  0x3a   :  { %v83_v26 = vadd.f32 %v82_v25, %v81_v23 }
  0x3c   :  { %163 = vlog2.f32 %v83_v26 }
  0x46   :  { %v164_v30 = vpop.eup %163 }
  0x47   :  { %v85_v31 = vmul.f32 0.6931472, %v164_v30 }
  0x49   :  { %v86_v33 = vadd.f32 %v85_v31, %v73_v10 }
  0x4b   :  { %v101_v34 = vsub.f32 %v100_v32, %v86_v33 }
  0x4d   :  { %v102_v35 = vmul.f32 1.442695, %v101_v34 }
  0x4f   :  { %165 = vpow2.f32 %v102_v35 }
  0x59   :  { %v166_v36 = vpop.eup %165 }
  0x5a   :  { %v104_v38 = vsub.f32 1.0, %v166_v36 }
  0x5c   :  { %v105_v39 = vmul.f32 %v104_v38, %v104_v38 }
  0x5e   :  { %v106_v40 = vmul.f32 %v105_v39, %v101_v34 }
  0x60   :  { %v115_v42 = vsel %vm114_vm2, %v106_v40, 0.0 }
  0x61   :  { %v116_v43 = vadd.f32 %v115_v42, %v113_v41 }
  0x63   :  { %117 = vst [vmem:[#allocation2] sm:$0x1] %v116_v43 }
  0x6a   :  { %v121_v44 = vld [vmem:[#allocation2] sm:$0x1] }
  0x6b   :  { %v123_v45 = vsel %vm122_vm3, %v121_v44, 0.0 }
  0x6c   :  { %124 = vadd.xlane.f32.xlu0 %v123_v45 }
  0xf9   :  { %v125_v46 = vpop.xlane.xlu0 %124 }
  0xfa   :  { %v126_v47 = vrot.slane %v125_v46, 4 }
  0xfc   :  { %v127_v48 = vadd.f32 %v126_v47, %v125_v46 }
  0xfe   :  { %v128_v49 = vrot.slane %v127_v48, 2 }
 0x100   :  { %v129_v50 = vadd.f32 %v128_v49, %v127_v48 }
 0x102   :  { %v130_v51 = vrot.slane %v129_v50, 1 }
 0x104   :  { %v131_v52 = vadd.f32 %v130_v51, %v129_v50 }
 0x106   :  { %156 = vpush %v131_v52 }
 0x137   :  { %s157_s23 = spop %156 }
 0x138   :  { %v133_v53 = vstv %s157_s23 }
 0x139   :  { %134 = vst [vmem:[#allocation7] sm:$0xff] %v133_v53 }
 0x13a   :  { %200 = shalt.err (!%p197_p12)
}
 0x13b   :  { %s201_s27 = scalar_lea.hbm %s265_s2, 128 }
 0x13c   :  { %p202_p13 = scmp.ne.s32.totalorder %s265_s2, %s201_s27  ;;  %p205_p0 = scmp.lt.u32.totalorder %s201_s27, %s265_s2 }
 0x13e   :  { %p207_p1 = pnand %p205_p0, %p202_p13 }
 0x140   :  { %210 = shalt.err (!%p207_p1)
}
 0x141   :  { %144 = dma.vmem_to_hbm [thread:$0]  %s142_s22, 128, %s265_s2, [#allocation6]  }
 0x142   :  { %213 = dma.done.wait [#allocation6], 128  }
 0x143   :  { %214 = vsyncadd [#allocation6], 4294967168 }
 0x144   :  { %148 = vsyncpa [#allocation5], 1 }
 0x145   :  { %149 = vsyncpa [#allocation6], 1 }

</bundles_post_ra>
